<compile_context>
chip_gen: v5e
topology: v5e:2x2
jax: 0.10.0
libtpu: 0.0.40
codegen_flags: <defaults>
</compile_context>

<pallas_src>
import jax
import jax.numpy as jnp
from jax.experimental import pallas as pl
from jax.experimental.pallas import tpu as pltpu


# Row layout of the packed small-vector parameter array (8, hidden), f32.
_ROW_B1, _ROW_G1, _ROW_BE1, _ROW_B2, _ROW_G2, _ROW_BE2, _ROW_WV, _ROW_BV = range(8)


def _critic_mix_kernel(xa_ref, wbig_ref, w2h_ref, vpk_ref, out_ref):
    eps = 1e-5
    B = out_ref.shape[0]
    hidden = w2h_ref.shape[0]

    b1 = vpk_ref[_ROW_B1:_ROW_B1 + 1, :]
    g1 = vpk_ref[_ROW_G1:_ROW_G1 + 1, :]
    be1 = vpk_ref[_ROW_BE1:_ROW_BE1 + 1, :]
    b2 = vpk_ref[_ROW_B2:_ROW_B2 + 1, :]
    g2 = vpk_ref[_ROW_G2:_ROW_G2 + 1, :]
    be2 = vpk_ref[_ROW_BE2:_ROW_BE2 + 1, :]
    wv = vpk_ref[_ROW_WV:_ROW_WV + 1, :]
    bv = vpk_ref[_ROW_BV:_ROW_BV + 1, 0:1]

    def layer_norm_relu(h, g, be):
        n = h.shape[-1]
        inv_n = 1.0 / float(n)
        # Single pass: the two cross-lane reductions are independent.
        s1 = jnp.sum(h, axis=-1, keepdims=True)
        s2 = jnp.sum(h * h, axis=-1, keepdims=True)
        mean = s1 * inv_n
        # Clamp: E[x^2]-mean^2 can round slightly negative under cancellation.
        var = jnp.maximum(s2 * inv_n - mean * mean, 0.0)
        y = (h - mean) * jax.lax.rsqrt(var + eps) * g + be
        return jnp.maximum(y, 0.0)

    # One fused K=3S MXU pass: rows [x; a] against columns [W1f | W2yf].
    cross = jnp.dot(xa_ref[...], wbig_ref[...],
                    preferred_element_type=jnp.float32)       # (2B, 2*hidden) f32
    h1 = layer_norm_relu(cross[:B, :hidden] + b1, g1, be1)    # (B, hidden) f32
    yh = cross[B:, hidden:]                                   # (B, hidden) f32

    # linear2 hidden-half (bf16 weights, f32 accumulation) + folded y-half.
    h2 = jnp.dot(h1.astype(w2h_ref.dtype), w2h_ref[...],
                 preferred_element_type=jnp.float32) + yh + b2
    h2 = layer_norm_relu(h2, g2, be2)                         # (B, hidden) f32

    # V head on VPU (multiply) + cross-lane sum instead of an N=1 MXU matmul.
    out_ref[...] = jnp.sum(h2 * wv, axis=-1, keepdims=True) + bv


def fold_params(params, weight_dtype=jnp.bfloat16):
    """One-time parameter folding: 1x1 convs absorbed into the linear weights,
    big weights fused and cast to `weight_dtype`, small vectors packed."""
    hidden, S3 = params["w1"].shape
    S = S3 // 3

    cw1 = params["conv1_w"].reshape(3, 3).astype(jnp.float32)    # (out_ch, in_ch)
    cb1 = params["conv1_b"].astype(jnp.float32)
    cw2 = params["conv2_w"].reshape(3, 3).astype(jnp.float32)
    cb2 = params["conv2_b"].astype(jnp.float32)

    # linear1: rows indexed by conv1 output channel o, spatial s.
    w1t3 = params["w1"].T.astype(jnp.float32).reshape(3, S, hidden)   # (o, s, h)
    w1f = jnp.einsum("oc,osh->csh", cw1, w1t3).reshape(S3, hidden)    # (c*S+s, h)
    b1f = params["b1"].astype(jnp.float32) + jnp.einsum("o,osh->h", cb1, w1t3)

    # linear2: hidden half kept separate; y half gets conv2 folded in.
    w2 = params["w2"].astype(jnp.float32)                              # (hidden, hidden+3S)
    w2h_t = w2[:, :hidden].T                                           # (hidden, hidden)
    w2y3 = w2[:, hidden:].T.reshape(3, S, hidden)                      # (o, s, h)
    w2yf = jnp.einsum("oc,osh->csh", cw2, w2y3).reshape(S3, hidden)    # (c*S+s, h)
    b2f = params["b2"].astype(jnp.float32) + jnp.einsum("o,osh->h", cb2, w2y3)

    wv_row = params["wv"].astype(jnp.float32).reshape(hidden)
    bv_row = jnp.full((hidden,), params["bv"].astype(jnp.float32).reshape(())[()])

    vpk = jnp.stack(
        [
            b1f,
            params["g1"].astype(jnp.float32),
            params["be1"].astype(jnp.float32),
            b2f,
            params["g2"].astype(jnp.float32),
            params["be2"].astype(jnp.float32),
            wv_row,
            bv_row,
        ],
        axis=0,
    )  # (8, hidden) f32

    return {
        # Fused K=3S weight: columns [W1f | W2yf], bf16.
        "w_big": jnp.concatenate([w1f, w2yf], axis=1).astype(weight_dtype),  # (3S, 2h)
        "w2h_t": w2h_t.astype(weight_dtype),                                 # (h, h)
        "vpk": vpk,                                                          # (8, h) f32
    }


def critic_mix_forward(inputs, actions, folded):
    """inputs/actions: NCHW (B, 3, H, W); folded: output of fold_params."""
    B, C, H, W = inputs.shape
    assert C == 3
    S3 = C * H * W
    hidden = folded["w2h_t"].shape[0]
    act_dtype = folded["w_big"].dtype

    # Free contiguous reshapes of NCHW -> channel-major flat layout, stacked so
    # the kernel does one (2B, 3S) @ (3S, 2*hidden) MXU pass.
    x = inputs.reshape(B, S3)
    a = actions.reshape(B, S3)
    xa = jnp.concatenate([x, a], axis=0).astype(act_dtype)   # (2B, 3S)

    def _nbytes(arr):
        return int(arr.size) * int(arr.dtype.itemsize)

    cost = pl.CostEstimate(
        flops=2 * (2 * B) * S3 * (2 * hidden) + 2 * B * hidden * hidden + 2 * B * hidden,
        transcendentals=2 * B,  # one rsqrt per row per LayerNorm
        bytes_accessed=(_nbytes(xa) + _nbytes(folded["w_big"])
                        + _nbytes(folded["w2h_t"]) + _nbytes(folded["vpk"])
                        + B * 1 * 4),
    )

    vmem = pl.BlockSpec(memory_space=pltpu.MemorySpace.VMEM)
    return pl.pallas_call(
        _critic_mix_kernel,
        out_shape=jax.ShapeDtypeStruct((B, 1), jnp.float32),
        in_specs=[vmem, vmem, vmem, vmem],
        out_specs=vmem,
        cost_estimate=cost,
    )(xa, folded["w_big"], folded["w2h_t"], folded["vpk"])


def _reference(inputs, actions, p):
    """Plain-JAX f32 reference of the PyTorch forward (unfolded params)."""
    B = inputs.shape[0]

    def conv1x1(x, w, b):
        return (jnp.einsum("oc,bchw->bohw", w.reshape(3, 3), x)
                + b[None, :, None, None])

    def ln(h, g, be):
        m = h.mean(-1, keepdims=True)
        v = ((h - m) ** 2).mean(-1, keepdims=True)
        return (h - m) / jnp.sqrt(v + 1e-5) * g + be

    x = conv1x1(inputs, p["conv1_w"], p["conv1_b"]).reshape(B, -1)
    h1 = jax.nn.relu(ln(x @ p["w1"].T + p["b1"], p["g1"], p["be1"]))
    y = conv1x1(actions, p["conv2_w"], p["conv2_b"]).reshape(B, -1)
    h2 = jnp.concatenate([h1, y], axis=1) @ p["w2"].T + p["b2"]
    h2 = jax.nn.relu(ln(h2, p["g2"], p["be2"]))
    return h2 @ p["wv"].T + p["bv"]


def _init_params(key, H, W, hidden):
    """Deterministic synthetic init matching the module's parameter shapes."""
    S3 = 3 * H * W
    ks = jax.random.split(key, 10)

    def u(k, shape, fan_in):
        bound = 1.0 / jnp.sqrt(float(fan_in))
        return jax.random.uniform(k, shape, jnp.float32, -bound, bound)

    return {
        "conv1_w": u(ks[0], (3, 3, 1, 1), 3),
        "conv1_b": u(ks[1], (3,), 3),
        "conv2_w": u(ks[2], (3, 3, 1, 1), 3),
        "conv2_b": u(ks[3], (3,), 3),
        "w1": u(ks[4], (hidden, S3), S3),
        "b1": u(ks[5], (hidden,), S3),
        "g1": jnp.ones((hidden,), jnp.float32),
        "be1": jnp.zeros((hidden,), jnp.float32),
        "w2": u(ks[6], (hidden, hidden + S3), hidden + S3),
        "b2": u(ks[7], (hidden,), hidden + S3),
        "g2": jnp.ones((hidden,), jnp.float32),
        "be2": jnp.zeros((hidden,), jnp.float32),
        # self.V weight/bias scaled by 0.1 as in the module __init__
        "wv": u(ks[8], (1, hidden), hidden) * 0.1,
        "bv": u(ks[9], (1,), hidden) * 0.1,
    }


if __name__ == "__main__":
    B, C, H, W = 2, 3, 16, 16
    hidden = 32

    key = jax.random.PRNGKey(0)
    k_in, k_act, k_par = jax.random.split(key, 3)

    inputs = jax.random.normal(k_in, (B, C, H, W), jnp.float32)
    actions = jax.random.normal(k_act, (B, C, H, W), jnp.float32)
    params = _init_params(k_par, H, W, hidden)

    # One-time parameter folding (not per-call work).
    folded = jax.tree_util.tree_map(jax.block_until_ready, fold_params(params))

    out = critic_mix_forward(inputs, actions, folded)
    out = jax.block_until_ready(out)

    ref = jax.block_until_ready(_reference(inputs, actions, params))
    assert out.shape == (B, 1), out.shape
    # Tolerance loosened vs. the pure-f32 version: weights/activations feed the
    # MXU in bf16 (f32 accumulation), which is expected quantization error.
    assert jnp.allclose(out, ref, atol=2e-2, rtol=2e-2), (out, ref)

    print("KERNEL_OK")
</pallas_src>

<mosaic_0001>
module attributes {stable_mosaic.version = 11 : i64} {
  func.func @_critic_mix_kernel(%arg0: memref<4x768xbf16, #tpu.memory_space<vmem>>, %arg1: memref<768x64xbf16, #tpu.memory_space<vmem>>, %arg2: memref<32x32xbf16, #tpu.memory_space<vmem>>, %arg3: memref<8x32xf32, #tpu.memory_space<vmem>>, %arg4: memref<2x1xf32, #tpu.memory_space<vmem>>) attributes {dimension_semantics = [], scalar_prefetch = 0 : i64, scratch_operands = 0 : i64, tpu.core_type = #tpu.core_type<tc>} {
    %c0 = arith.constant 0 : index
    %c0_0 = arith.constant 0 : index
    %0 = vector.load %arg3[%c0, %c0_0] : memref<8x32xf32, #tpu.memory_space<vmem>>, vector<1x32xf32>
    %c1 = arith.constant 1 : index
    %c0_1 = arith.constant 0 : index
    %1 = vector.load %arg3[%c1, %c0_1] : memref<8x32xf32, #tpu.memory_space<vmem>>, vector<1x32xf32>
    %c2 = arith.constant 2 : index
    %c0_2 = arith.constant 0 : index
    %2 = vector.load %arg3[%c2, %c0_2] : memref<8x32xf32, #tpu.memory_space<vmem>>, vector<1x32xf32>
    %c3 = arith.constant 3 : index
    %c0_3 = arith.constant 0 : index
    %3 = vector.load %arg3[%c3, %c0_3] : memref<8x32xf32, #tpu.memory_space<vmem>>, vector<1x32xf32>
    %c4 = arith.constant 4 : index
    %c0_4 = arith.constant 0 : index
    %4 = vector.load %arg3[%c4, %c0_4] : memref<8x32xf32, #tpu.memory_space<vmem>>, vector<1x32xf32>
    %c5 = arith.constant 5 : index
    %c0_5 = arith.constant 0 : index
    %5 = vector.load %arg3[%c5, %c0_5] : memref<8x32xf32, #tpu.memory_space<vmem>>, vector<1x32xf32>
    %c6 = arith.constant 6 : index
    %c0_6 = arith.constant 0 : index
    %6 = vector.load %arg3[%c6, %c0_6] : memref<8x32xf32, #tpu.memory_space<vmem>>, vector<1x32xf32>
    %c7 = arith.constant 7 : index
    %c0_7 = arith.constant 0 : index
    %7 = vector.load %arg3[%c7, %c0_7] : memref<8x32xf32, #tpu.memory_space<vmem>>, vector<1x1xf32>
    %c0_8 = arith.constant 0 : index
    %c0_9 = arith.constant 0 : index
    %8 = vector.load %arg0[%c0_8, %c0_9] : memref<4x768xbf16, #tpu.memory_space<vmem>>, vector<4x768xbf16>
    %c0_10 = arith.constant 0 : index
    %c0_11 = arith.constant 0 : index
    %9 = vector.load %arg1[%c0_10, %c0_11] : memref<768x64xbf16, #tpu.memory_space<vmem>>, vector<768x64xbf16>
    %cst = arith.constant dense<0.000000e+00> : vector<4x64xf32>
    %10 = tpu.matmul %8, %9, %cst {dimension_numbers = #tpu.dot_dimension_numbers<[1], [0], [0], [1], [0, 0, 1, 1], [], []>} : vector<4x768xbf16>, vector<768x64xbf16>, vector<4x64xf32> -> vector<4x64xf32>
    %11 = vector.extract_strided_slice %10 {offsets = [0, 0], sizes = [2, 32], strides = [1, 1]} : vector<4x64xf32> to vector<2x32xf32>
    %12 = vector.broadcast %0 : vector<1x32xf32> to vector<2x32xf32>
    %13 = arith.addf %11, %12 : vector<2x32xf32>
    %cst_12 = arith.constant dense<0.000000e+00> : vector<2xf32>
    %14 = vector.multi_reduction <add>, %13, %cst_12 [1] : vector<2x32xf32> to vector<2xf32>
    %15 = vector.shape_cast %14 : vector<2xf32> to vector<2x1xf32>
    %16 = arith.mulf %13, %13 : vector<2x32xf32>
    %cst_13 = arith.constant dense<0.000000e+00> : vector<2xf32>
    %17 = vector.multi_reduction <add>, %16, %cst_13 [1] : vector<2x32xf32> to vector<2xf32>
    %18 = vector.shape_cast %17 : vector<2xf32> to vector<2x1xf32>
    %cst_14 = arith.constant 3.125000e-02 : f32
    %19 = vector.broadcast %cst_14 : f32 to vector<2x1xf32>
    %20 = arith.mulf %15, %19 : vector<2x1xf32>
    %cst_15 = arith.constant 3.125000e-02 : f32
    %21 = vector.broadcast %cst_15 : f32 to vector<2x1xf32>
    %22 = arith.mulf %18, %21 : vector<2x1xf32>
    %23 = arith.mulf %20, %20 : vector<2x1xf32>
    %24 = arith.subf %22, %23 : vector<2x1xf32>
    %cst_16 = arith.constant 0.000000e+00 : f32
    %25 = vector.broadcast %cst_16 : f32 to vector<2x1xf32>
    %26 = arith.maximumf %24, %25 : vector<2x1xf32>
    %27 = vector.broadcast %20 : vector<2x1xf32> to vector<2x32xf32>
    %28 = arith.subf %13, %27 : vector<2x32xf32>
    %cst_17 = arith.constant 9.99999974E-6 : f32
    %29 = vector.broadcast %cst_17 : f32 to vector<2x1xf32>
    %30 = arith.addf %26, %29 : vector<2x1xf32>
    %31 = math.rsqrt %30 : vector<2x1xf32>
    %32 = vector.broadcast %31 : vector<2x1xf32> to vector<2x32xf32>
    %33 = arith.mulf %28, %32 : vector<2x32xf32>
    %34 = vector.broadcast %1 : vector<1x32xf32> to vector<2x32xf32>
    %35 = arith.mulf %33, %34 : vector<2x32xf32>
    %36 = vector.broadcast %2 : vector<1x32xf32> to vector<2x32xf32>
    %37 = arith.addf %35, %36 : vector<2x32xf32>
    %cst_18 = arith.constant 0.000000e+00 : f32
    %38 = vector.broadcast %cst_18 : f32 to vector<2x32xf32>
    %39 = arith.maximumf %37, %38 : vector<2x32xf32>
    %40 = vector.extract_strided_slice %10 {offsets = [2, 32], sizes = [2, 32], strides = [1, 1]} : vector<4x64xf32> to vector<2x32xf32>
    %41 = arith.truncf %39 : vector<2x32xf32> to vector<2x32xbf16>
    %c0_19 = arith.constant 0 : index
    %c0_20 = arith.constant 0 : index
    %42 = vector.load %arg2[%c0_19, %c0_20] : memref<32x32xbf16, #tpu.memory_space<vmem>>, vector<32x32xbf16>
    %cst_21 = arith.constant dense<0.000000e+00> : vector<2x32xf32>
    %43 = tpu.matmul %41, %42, %cst_21 {dimension_numbers = #tpu.dot_dimension_numbers<[1], [0], [0], [1], [0, 0, 1, 1], [], []>} : vector<2x32xbf16>, vector<32x32xbf16>, vector<2x32xf32> -> vector<2x32xf32>
    %44 = arith.addf %43, %40 : vector<2x32xf32>
    %45 = vector.broadcast %3 : vector<1x32xf32> to vector<2x32xf32>
    %46 = arith.addf %44, %45 : vector<2x32xf32>
    %cst_22 = arith.constant dense<0.000000e+00> : vector<2xf32>
    %47 = vector.multi_reduction <add>, %46, %cst_22 [1] : vector<2x32xf32> to vector<2xf32>
    %48 = vector.shape_cast %47 : vector<2xf32> to vector<2x1xf32>
    %49 = arith.mulf %46, %46 : vector<2x32xf32>
    %cst_23 = arith.constant dense<0.000000e+00> : vector<2xf32>
    %50 = vector.multi_reduction <add>, %49, %cst_23 [1] : vector<2x32xf32> to vector<2xf32>
    %51 = vector.shape_cast %50 : vector<2xf32> to vector<2x1xf32>
    %cst_24 = arith.constant 3.125000e-02 : f32
    %52 = vector.broadcast %cst_24 : f32 to vector<2x1xf32>
    %53 = arith.mulf %48, %52 : vector<2x1xf32>
    %cst_25 = arith.constant 3.125000e-02 : f32
    %54 = vector.broadcast %cst_25 : f32 to vector<2x1xf32>
    %55 = arith.mulf %51, %54 : vector<2x1xf32>
    %56 = arith.mulf %53, %53 : vector<2x1xf32>
    %57 = arith.subf %55, %56 : vector<2x1xf32>
    %cst_26 = arith.constant 0.000000e+00 : f32
    %58 = vector.broadcast %cst_26 : f32 to vector<2x1xf32>
    %59 = arith.maximumf %57, %58 : vector<2x1xf32>
    %60 = vector.broadcast %53 : vector<2x1xf32> to vector<2x32xf32>
    %61 = arith.subf %46, %60 : vector<2x32xf32>
    %cst_27 = arith.constant 9.99999974E-6 : f32
    %62 = vector.broadcast %cst_27 : f32 to vector<2x1xf32>
    %63 = arith.addf %59, %62 : vector<2x1xf32>
    %64 = math.rsqrt %63 : vector<2x1xf32>
    %65 = vector.broadcast %64 : vector<2x1xf32> to vector<2x32xf32>
    %66 = arith.mulf %61, %65 : vector<2x32xf32>
    %67 = vector.broadcast %4 : vector<1x32xf32> to vector<2x32xf32>
    %68 = arith.mulf %66, %67 : vector<2x32xf32>
    %69 = vector.broadcast %5 : vector<1x32xf32> to vector<2x32xf32>
    %70 = arith.addf %68, %69 : vector<2x32xf32>
    %cst_28 = arith.constant 0.000000e+00 : f32
    %71 = vector.broadcast %cst_28 : f32 to vector<2x32xf32>
    %72 = arith.maximumf %70, %71 : vector<2x32xf32>
    %73 = vector.broadcast %6 : vector<1x32xf32> to vector<2x32xf32>
    %74 = arith.mulf %72, %73 : vector<2x32xf32>
    %cst_29 = arith.constant dense<0.000000e+00> : vector<2xf32>
    %75 = vector.multi_reduction <add>, %74, %cst_29 [1] : vector<2x32xf32> to vector<2xf32>
    %76 = vector.shape_cast %75 : vector<2xf32> to vector<2x1xf32>
    %77 = vector.broadcast %7 : vector<1x1xf32> to vector<2x1xf32>
    %78 = arith.addf %76, %77 : vector<2x1xf32>
    %c0_30 = arith.constant 0 : index
    %c0_31 = arith.constant 0 : index
    %79 = vector.load %arg4[%c0_30, %c0_31] : memref<2x1xf32, #tpu.memory_space<vmem>>, vector<2x1xf32>
    tpu.vector_store %arg4[%c0_30, %c0_31], %78 {strides = array<i32>} : memref<2x1xf32, #tpu.memory_space<vmem>>, vector<2x1xf32>,
    return
  }
}

</mosaic_0001>

<bundles_post_ra>
// kernel: tpu_custom_call.1
= control target key start
LH: loop header
LB: loop body
LE: loop exit
PB: predicated region body
PF: predicated region fallthrough
CT: control target
= control target key end

     0   :  { %vm509_vm0 = vcmask 254976   ;;  %s888_s10 = smov 96   ;;  %vm562_vm4 = vcmask 261120   ;;  %vm618_vm8 = vcmask 1024   ;;  %s1102_s1 = inlined_call_operand.vmem [shape: bf16[768,64], index: 1, kind: input, shape index: {}]   ;;  %s1103_s0 = inlined_call_operand.vmem [shape: bf16[4,768], index: 0, kind: input, shape index: {}]   ;;  %s1104_s3 = inlined_call_operand.vmem [shape: f32[8,32], index: 3, kind: input, shape index: {}]   ;;  %s1105_s2 = inlined_call_operand.vmem [shape: bf16[32,32], index: 2, kind: input, shape index: {}]   ;;  %s1106_s4 = inlined_call_operand.vmem [shape: f32[2,1], index: 4, kind: output, shape index: {}]  }
   0x1   :  { %v832_v0 = vld [vmem:[%s1102_s1 + $0x38] sm:$0xff]  ;;  %v831_v2 = vld [vmem:[%s1102_s1 + $0x30] sm:$0xff]  ;;  %v830_v8 = vld [vmem:[%s1102_s1 + $0x28] sm:$0xff] }
   0x2   :  { %v840_v1 = vld [vmem:[%s1102_s1 + $0x78] sm:$0xff]  ;;  %429 = vmatpush.bf16.msra.mxu0 %v832_v0  ;;  %v839_v3 = vld [vmem:[%s1102_s1 + $0x70] sm:$0xff]  ;;  %v838_v9 = vld [vmem:[%s1102_s1 + $0x68] sm:$0xff] }
   0x3   :  { %442 = vmatpush.bf16.msra.mxu1 %v840_v1  ;;  %v848_v4 = vld [vmem:[%s1102_s1 + $0xb8] sm:$0xff]  ;;  %v847_v6 = vld [vmem:[%s1102_s1 + $0xb0] sm:$0xff]  ;;  %v846_v10 = vld [vmem:[%s1102_s1 + $0xa8] sm:$0xff] }
   0x4   :  { %v856_v5 = vld [vmem:[%s1102_s1 + $0xf8] sm:$0xff]  ;;  %455 = vmatpush.bf16.msra.mxu2 %v848_v4  ;;  %v855_v7 = vld [vmem:[%s1102_s1 + $0xf0] sm:$0xff]  ;;  %v854_v11 = vld [vmem:[%s1102_s1 + $0xe8] sm:$0xff] }
   0x5   :  { %468 = vmatpush.bf16.msra.mxu3 %v856_v5  ;;  %v829_v12 = vld [vmem:[%s1102_s1 + $0x20] sm:$0xff]  ;;  %v828_v17 = vld [vmem:[%s1102_s1 + $0x18] sm:$0xff]  ;;  %v827_v21 = vld [vmem:[%s1102_s1 + $0x10] sm:$0xff] }
   0x6   :  { %430 = vmatpush.bf16.msra.mxu0 %v831_v2  ;;  %v837_v13 = vld [vmem:[%s1102_s1 + $0x60] sm:$0xff]  ;;  %v836_v18 = vld [vmem:[%s1102_s1 + $0x58] sm:$0xff]  ;;  %v835_v22 = vld [vmem:[%s1102_s1 + $0x50] sm:$0xff] }
   0x7   :  { %443 = vmatpush.bf16.msra.mxu1 %v839_v3  ;;  %v26_v14 = vld [vmem:[%s1103_s0] sm:$0xff]  ;;  %v844_v19 = vld [vmem:[%s1102_s1 + $0x98] sm:$0xff]  ;;  %v843_v23 = vld [vmem:[%s1102_s1 + $0x90] sm:$0xff] }
   0x8   :  { %456 = vmatpush.bf16.msra.mxu2 %v847_v6  ;;  %v845_v15 = vld [vmem:[%s1102_s1 + $0xa0] sm:$0xff]  ;;  %125 = vst [vmem:[#allocation1] ss:$4 sm:$0xff] %v26_v14  ;;  %v852_v20 = vld [vmem:[%s1102_s1 + $0xd8] sm:$0xff]  ;;  %v851_v24 = vld [vmem:[%s1102_s1 + $0xd0] sm:$0xff] }
   0x9   :  { %469 = vmatpush.bf16.msra.mxu3 %v855_v7  ;;  %v853_v16 = vld [vmem:[%s1102_s1 + $0xe0] sm:$0xff]  ;;  %v27_v25 = vld [vmem:[%s1103_s0 + $0x8] sm:$0xf]  ;;  %v864_v32 = vld [vmem:[%s1102_s1 + $0x138] sm:$0xff] }
   0xa   :  { %431 = vmatpush.bf16.msra.mxu0 %v830_v8  ;;  %v826_v26 = vld [vmem:[%s1102_s1 + $0x8] sm:$0xff]  ;;  %128 = vst [vmem:[#allocation1 + $0x20] ss:$4 sm:$0xff] %v27_v25  ;;  %v825_v30 = vld [vmem:[%s1102_s1] sm:$0xff]  ;;  %v872_v33 = vld [vmem:[%s1102_s1 + $0x178] sm:$0xff] }
   0xb   :  { %444 = vmatpush.bf16.msra.mxu1 %v838_v9  ;;  %v834_v27 = vld [vmem:[%s1102_s1 + $0x48] sm:$0xff]  ;;  %v833_v31 = vld [vmem:[%s1102_s1 + $0x40] sm:$0xff]  ;;  %v863_v38 = vld [vmem:[%s1102_s1 + $0x130] sm:$0xff] }
   0xc   :  { %457 = vmatpush.bf16.msra.mxu2 %v846_v10  ;;  %v842_v28 = vld [vmem:[%s1102_s1 + $0x88] sm:$0xff]  ;;  %v841_v34 = vld [vmem:[%s1102_s1 + $0x80] sm:$0xff]  ;;  %v871_v39 = vld [vmem:[%s1102_s1 + $0x170] sm:$0xff] }
   0xd   :  { %470 = vmatpush.bf16.msra.mxu3 %v854_v11  ;;  %v850_v29 = vld [vmem:[%s1102_s1 + $0xc8] sm:$0xff]  ;;  %v849_v35 = vld [vmem:[%s1102_s1 + $0xc0] sm:$0xff]  ;;  %v860_v46 = vld [vmem:[%s1102_s1 + $0x118] sm:$0xff] }
   0xe   :  { %432 = vmatpush.bf16.msra.mxu0 %v829_v12  ;;  %v862_v42 = vld [vmem:[%s1102_s1 + $0x128] sm:$0xff]  ;;  %v861_v44 = vld [vmem:[%s1102_s1 + $0x120] sm:$0xff]  ;;  %v868_v47 = vld [vmem:[%s1102_s1 + $0x158] sm:$0xff] }
   0xf   :  { %445 = vmatpush.bf16.msra.mxu1 %v837_v13  ;;  %v129_v36 = vld.sshfl [vmem:[#allocation1] sm:$0xff pattern:$0x73625140]  ;;  %v130_v37 = vld.sshfl [vmem:[#allocation1 + $0x8] sm:$0xff pattern:$0x73625140] }
  0x10   :  { %458 = vmatpush.bf16.msra.mxu2 %v845_v15  ;;  %v131_v40 = vld.sshfl [vmem:[#allocation1 + $0x10] sm:$0xff pattern:$0x73625140]  ;;  %v132_v41 = vld.sshfl [vmem:[#allocation1 + $0x18] sm:$0xff pattern:$0x73625140] }
  0x11   :  { %471 = vmatpush.bf16.msra.mxu3 %v853_v16  ;;  %v870_v43 = vld [vmem:[%s1102_s1 + $0x168] sm:$0xff]  ;;  %v869_v45 = vld [vmem:[%s1102_s1 + $0x160] sm:$0xff]  ;;  %v859_v48 = vld [vmem:[%s1102_s1 + $0x110] sm:$0xff] }
  0x12   :  { %433 = vmatpush.bf16.msra.mxu0 %v828_v17  ;;  %v867_v49 = vld [vmem:[%s1102_s1 + $0x150] sm:$0xff]  ;;  %v858_v50 = vld [vmem:[%s1102_s1 + $0x108] sm:$0xff]  ;;  %v857_v52 = vld [vmem:[%s1102_s1 + $0x100] sm:$0xff] }
  0x13   :  { %446 = vmatpush.bf16.msra.mxu1 %v836_v18  ;;  %v866_v51 = vld [vmem:[%s1102_s1 + $0x148] sm:$0xff]  ;;  %v865_v53 = vld [vmem:[%s1102_s1 + $0x140] sm:$0xff] }
  0x14   :  { %459 = vmatpush.bf16.msra.mxu2 %v844_v19  ;;  %v133_v54 = vld.sshfl [vmem:[#allocation1 + $0x20] sm:$0xff pattern:$0x73625140]  ;;  %v134_v55 = vld.sshfl [vmem:[#allocation1 + $0x28] sm:$0xff pattern:$0x73625140] }
  0x15   :  { %472 = vmatpush.bf16.msra.mxu3 %v852_v20  ;;  %v876_v6 = vld [vmem:[%s1104_s3] ss:$0 sm:$0xff]  ;;  %v874_v16 = vld [vmem:[%s1105_s2 + $0x8] sm:$0xff] }
  0x16   :  { %434 = vmatpush.bf16.msra.mxu0 %v827_v21  ;;  %v873_v18 = vld [vmem:[%s1105_s2] sm:$0xff] }
  0x17   :  { %447 = vmatpush.bf16.msra.mxu1 %v835_v22 }
  0x18   :  { %460 = vmatpush.bf16.msra.mxu2 %v843_v23 }
  0x19   :  { %473 = vmatpush.bf16.msra.mxu3 %v851_v24 }
  0x1a   :  { %435 = vmatpush.bf16.msra.mxu0 %v826_v26 }
  0x1b   :  { %448 = vmatpush.bf16.msra.mxu1 %v834_v27 }
  0x1c   :  { %461 = vmatpush.bf16.msra.mxu2 %v842_v28 }
  0x1d   :  { %474 = vmatpush.bf16.msra.mxu3 %v850_v29 }
  0x1e   :  { %436 = vmatpush.bf16.msra.mxu0 %v825_v30 }
  0x1f   :  { %449 = vmatpush.bf16.msra.mxu1 %v833_v31 }
  0x20   :  { %462 = vmatpush.bf16.msra.mxu2 %v841_v34 }
  0x21   :  { %475 = vmatpush.bf16.msra.mxu3 %v849_v35  ;;  %437 = vmatmul.bf16.vlgmr.msra.gmra.mxu0 %v129_v36  ;;  %v878_v35 = vld [vmem:[%s1104_s3 + $0x2] ss:$0 sm:$0xff] }
  0x22   :  { %481 = vmatpush.bf16.msrb.mxu0 %v864_v32  ;;  %450 = vmatmul.bf16.vlgmr.msra.gmra.mxu1 %v130_v37  ;;  %v877_v32 = vld [vmem:[%s1104_s3 + $0x1] ss:$0 sm:$0xff] }
  0x23   :  { %494 = vmatpush.bf16.msrb.mxu1 %v872_v33  ;;  %463 = vmatmul.bf16.vlgmr.msra.gmra.mxu2 %v131_v40  ;;  %v879_v40 = vld [vmem:[%s1104_s3 + $0x3] ss:$0 sm:$0xff] }
  0x24   :  { %476 = vmatmul.bf16.vlgmr.msra.gmra.mxu3 %v132_v41  ;;  %572 = vmatpush.bf16.msrb.mxu2 %v874_v16 }
  0x26   :  { %482 = vmatpush.bf16.msrb.mxu0 %v863_v38 }
  0x27   :  { %495 = vmatpush.bf16.msrb.mxu1 %v871_v39 }
  0x28   :  { %573 = vmatpush.bf16.msrb.mxu2 %v873_v18 }
  0x2a   :  { %483 = vmatpush.bf16.msrb.mxu0 %v862_v42 }
  0x2b   :  { %496 = vmatpush.bf16.msrb.mxu1 %v870_v43 }
  0x2e   :  { %484 = vmatpush.bf16.msrb.mxu0 %v861_v44 }
  0x2f   :  { %497 = vmatpush.bf16.msrb.mxu1 %v869_v45 }
  0x32   :  { %485 = vmatpush.bf16.msrb.mxu0 %v860_v46 }
  0x33   :  { %498 = vmatpush.bf16.msrb.mxu1 %v868_v47 }
  0x36   :  { %486 = vmatpush.bf16.msrb.mxu0 %v859_v48 }
  0x37   :  { %499 = vmatpush.bf16.msrb.mxu1 %v867_v49 }
  0x3a   :  { %487 = vmatpush.bf16.msrb.mxu0 %v858_v50 }
  0x3b   :  { %500 = vmatpush.bf16.msrb.mxu1 %v866_v51 }
  0x3e   :  { %488 = vmatpush.bf16.msrb.mxu0 %v857_v52 }
  0x3f   :  { %501 = vmatpush.bf16.msrb.mxu1 %v865_v53 }
  0x41   :  { %489 = vmatmul.bf16.vlgmr.msrb.gmra.mxu0 %v133_v54 }
  0x42   :  { %502 = vmatmul.bf16.vlgmr.msrb.gmra.mxu1 %v134_v55 }
  0x9e   :  { %v438_v56 = vpop.f32.mrf.mxu0 }
  0x9f   :  { %v451_v57 = vpop.f32.mrf.mxu1 }
  0xa0   :  { %v452_v0 = vadd.f32 %v451_v57, %v438_v56 }
  0xa6   :  { %v440_v58 = vpop.f32.mrf.mxu0  ;;  %v464_v60 = vpop.f32.mrf.mxu2 }
  0xa7   :  { %v453_v59 = vpop.f32.mrf.mxu1  ;;  %v477_v61 = vpop.f32.mrf.mxu3  ;;  %v465_v1 = vadd.f32 %v464_v60, %v452_v0  ;;  %v880_v0 = vld [vmem:[%s1104_s3 + $0x4] ss:$0 sm:$0xff] }
  0xa9   :  { %v478_v2 = vadd.f32 %v477_v61, %v465_v1 }
  0xae   :  { %v466_v62 = vpop.f32.mrf.mxu2 }
  0xaf   :  { %v479_v63 = vpop.f32.mrf.mxu3 }
  0xbe   :  { %v490_v3 = vpop.f32.mrf.mxu0 }
  0xbf   :  { %v503_v4 = vpop.f32.mrf.mxu1  ;;  %v491_v5 = vadd.f32 %v490_v3, %v478_v2  ;;  %v881_v3 = vld [vmem:[%s1104_s3 + $0x5] ss:$0 sm:$0xff] }
  0xc1   :  { %v504_v7 = vadd.f32 %v503_v4, %v491_v5 }
  0xc3   :  { %v508_v8 = vadd.f32 %v876_v6, %v504_v7  ;;  %v558_v9 = vrot.slane %v504_v7, 2  ;;  %v882_v6 = vld [vmem:[%s1104_s3 + $0x6] ss:$0 sm:$0xff] }
  0xc5   :  { %559 = vrot.lane.b32.xlu1 %v558_v9, %s888_s10  ;;  %v510_v10 = vsel %vm509_vm0, %v508_v8, 0.0  ;;  %v513_v13 = vmul.f32 %v508_v8, %v508_v8 }
  0xc6   :  { %v492_v11 = vpop.f32.mrf.mxu0  ;;  %511 = vadd.xlane.f32.xlu0 %v510_v10  ;;  %v883_v10 = vld [vmem:[%s1104_s3 + $0x7] ss:$0 sm:$0xff] }
  0xc7   :  { %v505_v12 = vpop.f32.mrf.mxu1  ;;  %v514_v14 = vsel %vm509_vm0, %v513_v13, 0.0 }
  0xce   :  { %515 = vadd.xlane.f32.xlu0 %v514_v14 }
 0x137   :  { %v560_v41 = vpop.permute.xlu1 %559 }
 0x139   :  { %v512_v15 = vpop.xlane.xlu0 %511 }
 0x13a   :  { %v517_v17 = vmul.f32 0.03125, %v512_v15 }
 0x13c   :  { %v519_v20 = vmul.f32 %v517_v17, %v517_v17  ;;  %v522_v31 = vsub.f32 %v508_v8, %v517_v17 }
 0x141   :  { %v516_v19 = vpop.xlane.xlu0 %515 }
 0x142   :  { %v518_v21 = vmul.f32 0.03125, %v516_v19 }
 0x144   :  { %v520_v22 = vsub.f32 %v518_v21, %v519_v20 }
 0x146   :  { %v521_v23 = vmax.f32 %v520_v22, 0.0 }
 0x148   :  { %v523_v24 = vadd.f32 1e-05, %v521_v23 }
 0x14a   :  { %884 = vrsqrt.f32 %v523_v24  ;;  %vm530_vm2 = vweird.f32 %v523_v24 }
 0x150   :  { %v885_v25 = vpop.eup %884 }
 0x151   :  { %v525_v26 = vmul.f32 %v885_v25, %v523_v24  ;;  %vm531_vm1 = vweird.f32 %v885_v25 }
 0x152   :  { %vm532_vm3 = vmor %vm530_vm2, %vm531_vm1 }
 0x153   :  { %v526_v27 = vmul.f32 %v885_v25, %v525_v26 }
 0x155   :  { %v527_v28 = vmul.f32 0.5, %v526_v27 }
 0x157   :  { %v528_v29 = vsub.f32 1.5, %v527_v28 }
 0x159   :  { %v529_v30 = vmul.f32 %v885_v25, %v528_v29 }
 0x15b   :  { %v533_v33 = vsel %vm532_vm3, %v885_v25, %v529_v30 }
 0x15c   :  { %v534_v34 = vmul.f32 %v533_v33, %v522_v31 }
 0x15e   :  { %v536_v36 = vmul.f32 %v877_v32, %v534_v34 }
 0x160   :  { %v538_v37 = vadd.f32 %v878_v35, %v536_v36 }
 0x162   :  { %v539_v38 = vmax.f32 %v538_v37, 0.0 }
 0x164   :  { %v540_v39 = vpack.c.bf16 %v539_v38, %v539_v38 }
 0x166   :  { %824 = vmatmul.msk.bf16.vlgmr.msrb.gmra.mxu2 %vm562_vm4, %v540_v39 }
 0x1e9   :  { %v575_v42 = vpop.f32.mrf.mxu2 }
 0x1ea   :  { %v576_v43 = vadd.f32 %v575_v42, %v560_v41 }
 0x1ec   :  { %v580_v44 = vadd.f32 %v879_v40, %v576_v43 }
 0x1ee   :  { %v581_v45 = vsel %vm509_vm0, %v580_v44, 0.0  ;;  %v584_v46 = vmul.f32 %v580_v44, %v580_v44 }
 0x1ef   :  { %582 = vadd.xlane.f32.xlu1 %v581_v45 }
 0x1f0   :  { %v585_v47 = vsel %vm509_vm0, %v584_v46, 0.0 }
 0x1f1   :  { %v577_v48 = vpop.f32.mrf.mxu2  ;;  %586 = vadd.xlane.f32.xlu2 %v585_v47 }
 0x262   :  { %v583_v49 = vpop.xlane.xlu1 %582 }
 0x263   :  { %v588_v50 = vmul.f32 0.03125, %v583_v49 }
 0x264   :  { %v587_v51 = vpop.xlane.xlu2 %586 }
 0x265   :  { %v590_v52 = vmul.f32 %v588_v50, %v588_v50  ;;  %v589_v53 = vmul.f32 0.03125, %v587_v51  ;;  %v593_v63 = vsub.f32 %v580_v44, %v588_v50 }
 0x267   :  { %v591_v54 = vsub.f32 %v589_v53, %v590_v52 }
 0x269   :  { %v592_v55 = vmax.f32 %v591_v54, 0.0 }
 0x26b   :  { %v594_v56 = vadd.f32 1e-05, %v592_v55 }
 0x26d   :  { %886 = vrsqrt.f32 %v594_v56  ;;  %vm601_vm6 = vweird.f32 %v594_v56 }
 0x273   :  { %v887_v57 = vpop.eup %886 }
 0x274   :  { %v596_v58 = vmul.f32 %v887_v57, %v594_v56  ;;  %vm602_vm5 = vweird.f32 %v887_v57 }
 0x275   :  { %vm603_vm7 = vmor %vm601_vm6, %vm602_vm5 }
 0x276   :  { %v597_v59 = vmul.f32 %v887_v57, %v596_v58 }
 0x278   :  { %v598_v60 = vmul.f32 0.5, %v597_v59 }
 0x27a   :  { %v599_v61 = vsub.f32 1.5, %v598_v60 }
 0x27c   :  { %v600_v62 = vmul.f32 %v887_v57, %v599_v61 }
 0x27e   :  { %v604_v1 = vsel %vm603_vm7, %v887_v57, %v600_v62 }
 0x27f   :  { %v605_v2 = vmul.f32 %v604_v1, %v593_v63 }
 0x281   :  { %v607_v4 = vmul.f32 %v880_v0, %v605_v2 }
 0x283   :  { %v609_v5 = vadd.f32 %v881_v3, %v607_v4 }
 0x285   :  { %v610_v7 = vmax.f32 %v609_v5, 0.0 }
 0x287   :  { %v612_v8 = vmul.f32 %v882_v6, %v610_v7 }
 0x289   :  { %v613_v9 = vsel %vm509_vm0, %v612_v8, 0.0 }
 0x28a   :  { %614 = vadd.xlane.f32.xlu2 %v613_v9 }
 0x2fd   :  { %v615_v11 = vpop.xlane.xlu2 %614 }
 0x2fe   :  { %v617_v12 = vadd.f32 %v883_v10, %v615_v11 }
 0x300   :  { %619 = vst.msk [vmem:[%s1106_s4] sm:$0x3] %vm618_vm8, %v617_v12 }

</bundles_post_ra>
